<compile_context>
chip_gen: v5e
topology: v5e:2x2
jax: 0.10.0
libtpu: 0.0.40
codegen_flags: <defaults>
</compile_context>

<pallas_src>
import functools

import jax
import jax.numpy as jnp
from jax import lax
from jax.experimental import pallas as pl
from jax.experimental.pallas import tpu as pltpu


def _round_up(n, m):
    return ((n + m - 1) // m) * m


def actor_kernel(obs_ref, w1_ref, b1_ref, g_ref, be_ref,
                 w2_ref, b2_ref, w3_ref, b3_ref, out_ref, *, real_h):
    # obs: (Bt, obs_dim) bf16
    # w1: (obs_dim, Hp) bf16   b1/g/be: (1, Hp) f32
    # w2: (Hp, Hp) bf16        b2: (1, Hp) f32
    # w3: (Hp, 2*half) bf16    b3: (1, 2*half) f32
    f32 = jnp.float32
    bf16 = jnp.bfloat16

    x = obs_ref[...]                                         # bf16

    # Linear 1 — native bf16 MXU matmul, f32 accumulation.
    h1 = jnp.dot(x, w1_ref[...], preferred_element_type=f32) + b1_ref[...]

    # LayerNorm over the REAL hidden width (eps=1e-5).  Padded lanes of h1 are
    # exactly zero (zero-padded w1 columns / b1), so plain full-lane sums equal
    # sums over the real lanes; only the divisor uses real_h.  Single-pass
    # statistics (E[x^2]-mu^2) with a >=0 guard against cancellation.
    inv_h = 1.0 / real_h
    s = jnp.sum(h1, axis=-1, keepdims=True)
    ss = jnp.sum(h1 * h1, axis=-1, keepdims=True)
    mean = s * inv_h
    var = jnp.maximum(ss * inv_h - mean * mean, 0.0)
    ln = (h1 - mean) * lax.rsqrt(var + 1e-5)
    ln = ln * g_ref[...] + be_ref[...]                        # padded gamma lanes are 0

    # Tanh -> Linear 2 -> ReLU  (bf16 MXU inputs, f32 accumulate)
    t = jnp.tanh(ln)
    h2 = jnp.dot(t.astype(bf16), w2_ref[...], preferred_element_type=f32) + b2_ref[...]
    h2 = jnp.maximum(h2, 0.0)

    # Linear 3 -> y = [mu_raw lanes 0..half) | log_std lanes half..2*half)
    y = jnp.dot(h2.astype(bf16), w3_ref[...], preferred_element_type=f32) + b3_ref[...]

    # Fused head post-processing via a 128-aligned lane select: tanh on the mu
    # half, clamp+exp on the std half.  tanh/exp both run on the EUP slot, so
    # evaluating both over all lanes is effectively free; no cross-lane slicing.
    half = out_ref.shape[-1] // 2
    lane = lax.broadcasted_iota(jnp.int32, y.shape, dimension=1)
    mu_half = jnp.tanh(y)
    std_half = jnp.exp(jnp.clip(y, -10.0, 2.0))
    out_ref[...] = jnp.where(lane < half, mu_half, std_half).astype(out_ref.dtype)


def _vmem_limit_bytes(block_b, obs_dim, hp, out_w):
    # Resident bf16 weights + f32 biases/LN params, double-buffered streamed
    # obs/out tiles, f32 intermediates, plus generous slack.  Floor at the
    # 32 MiB scoped default; cap at 64 MiB so it is valid on every generation.
    w = 2 * (obs_dim * hp + hp * hp + hp * out_w)
    b = 4 * (4 * hp + out_w)
    io = 2 * 2 * block_b * obs_dim + 2 * 4 * block_b * out_w
    act = 4 * block_b * (2 * hp + out_w)
    need = 2 * (w + b) + io + act + (4 << 20)
    return int(min(max(need, 32 << 20), 64 << 20))


def _make_pallas_fn(kernel_fn, B, obs_dim, hp, out_w, block_b, single_buffer_weights):
    grid = (pl.cdiv(B, block_b),)

    if single_buffer_weights:
        # Resident operands never change blocks -> one pipeline buffer is enough.
        def resident(shape):
            return pl.BlockSpec(shape, lambda i: (0, 0), pipeline_mode=pl.Buffered(1))
    else:
        def resident(shape):
            return pl.BlockSpec(shape, lambda i: (0, 0))

    return pl.pallas_call(
        kernel_fn,
        out_shape=jax.ShapeDtypeStruct((B, out_w), jnp.float32),
        grid_spec=pltpu.PrefetchScalarGridSpec(
            num_scalar_prefetch=0,
            grid=grid,
            in_specs=[
                pl.BlockSpec((block_b, obs_dim), lambda i: (i, 0)),   # obs (streamed)
                resident((obs_dim, hp)),                              # w1 (resident)
                resident((1, hp)),                                    # b1
                resident((1, hp)),                                    # ln gamma
                resident((1, hp)),                                    # ln beta
                resident((hp, hp)),                                   # w2
                resident((1, hp)),                                    # b2
                resident((hp, out_w)),                                # w3
                resident((1, out_w)),                                 # b3
            ],
            out_specs=pl.BlockSpec((block_b, out_w), lambda i: (i, 0)),
        ),
        compiler_params=pltpu.CompilerParams(
            dimension_semantics=("parallel",),
            vmem_limit_bytes=_vmem_limit_bytes(block_b, obs_dim, hp, out_w)),
    )


def actor_forward(obs, params, *, block_b=None):
    """Returns (mu, std), each (B, action_dim) — the SquashedNormal parameters."""
    hidden_dim = int(params["hidden_dim"])
    action_dim = int(params["action_dim"])

    obs = obs.astype(jnp.bfloat16)          # bf16 streaming: halves obs DMA bytes
    B, obs_dim = obs.shape
    hp = params["w1"].shape[-1]             # padded hidden width (multiple of 128)
    out_w = params["w3"].shape[-1]          # 2 * padded action width
    half = out_w // 2

    if block_b is None:
        if B <= 256:
            block_b = B
        else:
            # >=2 grid steps so Megacore (v7x) can split the batch, while keeping
            # tiles large (up to 512 rows) to amortize per-step overhead (v5e/v6e).
            block_b = min(512, _round_up((B + 1) // 2, 8))

    kernel_fn = functools.partial(actor_kernel, real_h=hidden_dim)
    args = (obs, params["w1"], params["b1"], params["g"], params["be"],
            params["w2"], params["b2"], params["w3"], params["b3"])

    try:
        out = _make_pallas_fn(kernel_fn, B, obs_dim, hp, out_w, block_b, True)(*args)
    except Exception:
        # Fallback for JAX versions without per-BlockSpec pipeline_mode support.
        out = _make_pallas_fn(kernel_fn, B, obs_dim, hp, out_w, block_b, False)(*args)

    mu = out[:, :action_dim]                # 128-aligned slice starts
    std = out[:, half:half + action_dim]
    return mu, std


def init_params(key, obs_dim, action_dim, hidden_dim):
    """Deterministic synthetic init.

    Weights stored (in, out) in bf16, zero-padded so the hidden width and each
    output head are 128-lane multiples; LayerNorm gamma is zero on padded lanes
    so the padding stays exactly zero through the network.
    """
    ks = jax.random.split(key, 6)
    hp = _round_up(hidden_dim, 128)
    half = _round_up(action_dim, 128)
    out_p = 2 * half
    s1 = 1.0 / jnp.sqrt(obs_dim)
    s2 = 1.0 / jnp.sqrt(hidden_dim)
    bf16 = jnp.bfloat16

    def pad2(a, shape):
        z = jnp.zeros(shape, a.dtype)
        return z.at[:a.shape[0], :a.shape[1]].set(a)

    w1 = jax.random.normal(ks[0], (obs_dim, hidden_dim), jnp.float32) * s1
    b1 = jax.random.normal(ks[1], (1, hidden_dim), jnp.float32) * 0.01
    w2 = jax.random.normal(ks[2], (hidden_dim, hidden_dim), jnp.float32) * s2
    b2 = jax.random.normal(ks[3], (1, hidden_dim), jnp.float32) * 0.01
    w3 = jax.random.normal(ks[4], (hidden_dim, 2 * action_dim), jnp.float32) * s2
    b3 = jax.random.normal(ks[5], (1, 2 * action_dim), jnp.float32) * 0.01

    # Lane-dense head layout: mu columns at [0, action_dim),
    # log_std columns at [half, half + action_dim).
    w3p = jnp.zeros((hp, out_p), jnp.float32)
    w3p = w3p.at[:hidden_dim, :action_dim].set(w3[:, :action_dim])
    w3p = w3p.at[:hidden_dim, half:half + action_dim].set(w3[:, action_dim:])
    b3p = jnp.zeros((1, out_p), jnp.float32)
    b3p = b3p.at[:, :action_dim].set(b3[:, :action_dim])
    b3p = b3p.at[:, half:half + action_dim].set(b3[:, action_dim:])

    g = jnp.zeros((1, hp), jnp.float32).at[:, :hidden_dim].set(1.0)
    be = jnp.zeros((1, hp), jnp.float32)

    return {
        "w1": pad2(w1, (obs_dim, hp)).astype(bf16),
        "b1": pad2(b1, (1, hp)),
        "g": g,
        "be": be,
        "w2": pad2(w2, (hp, hp)).astype(bf16),
        "b2": pad2(b2, (1, hp)),
        "w3": w3p.astype(bf16),
        "b3": b3p,
        "hidden_dim": hidden_dim,
        "action_dim": action_dim,
    }


def actor_reference_bf16(obs, params):
    """Pure-JAX reference mirroring the kernel's numerics (bf16 MXU inputs)."""
    f32, bf16 = jnp.float32, jnp.bfloat16
    real_h = params["hidden_dim"]
    a_dim = params["action_dim"]
    x = obs.astype(bf16)
    h1 = jnp.dot(x, params["w1"], preferred_element_type=f32) + params["b1"]
    inv_h = 1.0 / real_h
    mean = jnp.sum(h1, -1, keepdims=True) * inv_h
    var = jnp.maximum(jnp.sum(h1 * h1, -1, keepdims=True) * inv_h - mean * mean, 0.0)
    ln = (h1 - mean) * lax.rsqrt(var + 1e-5) * params["g"] + params["be"]
    t = jnp.tanh(ln)
    h2 = jnp.maximum(
        jnp.dot(t.astype(bf16), params["w2"], preferred_element_type=f32) + params["b2"], 0.0)
    y = jnp.dot(h2.astype(bf16), params["w3"], preferred_element_type=f32) + params["b3"]
    half = y.shape[-1] // 2
    mu = jnp.tanh(y[:, :a_dim])
    std = jnp.exp(jnp.clip(y[:, half:half + a_dim], -10.0, 2.0))
    return mu, std


def actor_reference_f32(obs, params):
    """Full-f32, two-pass-LayerNorm reference on the un-padded slices
    (mirrors the PyTorch module's math; weights are the same bf16-stored values)."""
    f32 = jnp.float32
    H = params["hidden_dim"]
    A = params["action_dim"]
    half = params["w3"].shape[-1] // 2
    w1 = params["w1"][:, :H].astype(f32); b1 = params["b1"][:, :H]
    g = params["g"][:, :H]; be = params["be"][:, :H]
    w2 = params["w2"][:H, :H].astype(f32); b2 = params["b2"][:, :H]
    w3 = jnp.concatenate([params["w3"][:H, :A], params["w3"][:H, half:half + A]], -1).astype(f32)
    b3 = jnp.concatenate([params["b3"][:, :A], params["b3"][:, half:half + A]], -1)
    x = obs.astype(f32)
    h1 = x @ w1 + b1
    mean = jnp.mean(h1, -1, keepdims=True)
    var = jnp.mean((h1 - mean) ** 2, -1, keepdims=True)
    ln = (h1 - mean) / jnp.sqrt(var + 1e-5) * g + be
    h2 = jnp.maximum(jnp.tanh(ln) @ w2 + b2, 0.0)
    y = h2 @ w3 + b3
    return jnp.tanh(y[:, :A]), jnp.exp(jnp.clip(y[:, A:], -10.0, 2.0))


if __name__ == "__main__":
    B, obs_dim, action_dim, hidden_dim = 8, 12, 4, 32
    key = jax.random.PRNGKey(0)
    k_obs, k_par = jax.random.split(key, 2)

    obs = jax.random.normal(k_obs, (B, obs_dim), jnp.float32)
    params = init_params(k_par, obs_dim, action_dim, hidden_dim)

    mu, std = actor_forward(obs, params)
    mu = jax.block_until_ready(mu)
    std = jax.block_until_ready(std)

    assert mu.shape == (B, action_dim) and std.shape == (B, action_dim)
    assert bool(jnp.all(std > 0.0))
    assert bool(jnp.all(jnp.abs(mu) <= 1.0))

    # Kernel vs reference with identical numerics (bf16 MXU inputs, f32 accum).
    r_mu, r_std = actor_reference_bf16(obs, params)
    assert jnp.allclose(mu, r_mu, atol=1e-2, rtol=1e-2)
    assert jnp.allclose(std, r_std, atol=1e-2, rtol=1e-2)

    # Kernel vs full-f32 module semantics (looser tolerance for bf16 matmuls).
    f_mu, f_std = actor_reference_f32(obs, params)
    assert jnp.allclose(mu, f_mu, atol=5e-2, rtol=5e-2)
    assert jnp.allclose(std, f_std, atol=5e-2, rtol=5e-2)

    print("KERNEL_OK")
</pallas_src>

<mosaic_0001>
module attributes {stable_mosaic.version = 11 : i64} {
  func.func @actor_kernel(%arg0: i32, %arg1: memref<8x12xbf16, #tpu.memory_space<vmem>>, %arg2: memref<12x128xbf16, #tpu.memory_space<vmem>>, %arg3: memref<1x128xf32, #tpu.memory_space<vmem>>, %arg4: memref<1x128xf32, #tpu.memory_space<vmem>>, %arg5: memref<1x128xf32, #tpu.memory_space<vmem>>, %arg6: memref<128x128xbf16, #tpu.memory_space<vmem>>, %arg7: memref<1x128xf32, #tpu.memory_space<vmem>>, %arg8: memref<128x256xbf16, #tpu.memory_space<vmem>>, %arg9: memref<1x256xf32, #tpu.memory_space<vmem>>, %arg10: memref<8x256xf32, #tpu.memory_space<vmem>>) attributes {dimension_semantics = [#tpu.dimension_semantics<parallel>], iteration_bounds = array<i64: 1>, scalar_prefetch = 0 : i64, scratch_operands = 0 : i64, tpu.core_type = #tpu.core_type<tc>, window_params = [{transform_indices = @transform_0, window_bounds = array<i64: 8, 12>}, {pipeline_mode = #tpu.pipeline_mode<synchronous>, transform_indices = @transform_1, window_bounds = array<i64: 12, 128>}, {pipeline_mode = #tpu.pipeline_mode<synchronous>, transform_indices = @transform_2, window_bounds = array<i64: 1, 128>}, {pipeline_mode = #tpu.pipeline_mode<synchronous>, transform_indices = @transform_3, window_bounds = array<i64: 1, 128>}, {pipeline_mode = #tpu.pipeline_mode<synchronous>, transform_indices = @transform_4, window_bounds = array<i64: 1, 128>}, {pipeline_mode = #tpu.pipeline_mode<synchronous>, transform_indices = @transform_5, window_bounds = array<i64: 128, 128>}, {pipeline_mode = #tpu.pipeline_mode<synchronous>, transform_indices = @transform_6, window_bounds = array<i64: 1, 128>}, {pipeline_mode = #tpu.pipeline_mode<synchronous>, transform_indices = @transform_7, window_bounds = array<i64: 128, 256>}, {pipeline_mode = #tpu.pipeline_mode<synchronous>, transform_indices = @transform_8, window_bounds = array<i64: 1, 256>}, {transform_indices = @transform_9, window_bounds = array<i64: 8, 256>}]} {
    %c0 = arith.constant 0 : index
    %c0_0 = arith.constant 0 : index
    %0 = vector.load %arg1[%c0, %c0_0] : memref<8x12xbf16, #tpu.memory_space<vmem>>, vector<8x12xbf16>
    %c0_1 = arith.constant 0 : index
    %c0_2 = arith.constant 0 : index
    %1 = vector.load %arg2[%c0_1, %c0_2] : memref<12x128xbf16, #tpu.memory_space<vmem>>, vector<12x128xbf16>
    %cst = arith.constant dense<0.000000e+00> : vector<8x128xf32>
    %2 = tpu.matmul %0, %1, %cst {dimension_numbers = #tpu.dot_dimension_numbers<[1], [0], [0], [1], [0, 0, 1, 1], [], []>} : vector<8x12xbf16>, vector<12x128xbf16>, vector<8x128xf32> -> vector<8x128xf32>
    %c0_3 = arith.constant 0 : index
    %c0_4 = arith.constant 0 : index
    %3 = vector.load %arg3[%c0_3, %c0_4] : memref<1x128xf32, #tpu.memory_space<vmem>>, vector<1x128xf32>
    %4 = vector.broadcast %3 : vector<1x128xf32> to vector<8x128xf32>
    %5 = arith.addf %2, %4 : vector<8x128xf32>
    %cst_5 = arith.constant dense<0.000000e+00> : vector<8xf32>
    %6 = vector.multi_reduction <add>, %5, %cst_5 [1] : vector<8x128xf32> to vector<8xf32>
    %7 = vector.shape_cast %6 : vector<8xf32> to vector<8x1xf32>
    %8 = arith.mulf %5, %5 : vector<8x128xf32>
    %cst_6 = arith.constant dense<0.000000e+00> : vector<8xf32>
    %9 = vector.multi_reduction <add>, %8, %cst_6 [1] : vector<8x128xf32> to vector<8xf32>
    %10 = vector.shape_cast %9 : vector<8xf32> to vector<8x1xf32>
    %cst_7 = arith.constant 3.125000e-02 : f32
    %11 = vector.broadcast %cst_7 : f32 to vector<8x1xf32>
    %12 = arith.mulf %7, %11 : vector<8x1xf32>
    %cst_8 = arith.constant 3.125000e-02 : f32
    %13 = vector.broadcast %cst_8 : f32 to vector<8x1xf32>
    %14 = arith.mulf %10, %13 : vector<8x1xf32>
    %15 = arith.mulf %12, %12 : vector<8x1xf32>
    %16 = arith.subf %14, %15 : vector<8x1xf32>
    %cst_9 = arith.constant 0.000000e+00 : f32
    %17 = vector.broadcast %cst_9 : f32 to vector<8x1xf32>
    %18 = arith.maximumf %16, %17 : vector<8x1xf32>
    %19 = vector.broadcast %12 : vector<8x1xf32> to vector<8x128xf32>
    %20 = arith.subf %5, %19 : vector<8x128xf32>
    %cst_10 = arith.constant 9.99999974E-6 : f32
    %21 = vector.broadcast %cst_10 : f32 to vector<8x1xf32>
    %22 = arith.addf %18, %21 : vector<8x1xf32>
    %23 = math.rsqrt %22 : vector<8x1xf32>
    %24 = vector.broadcast %23 : vector<8x1xf32> to vector<8x128xf32>
    %25 = arith.mulf %20, %24 : vector<8x128xf32>
    %c0_11 = arith.constant 0 : index
    %c0_12 = arith.constant 0 : index
    %26 = vector.load %arg4[%c0_11, %c0_12] : memref<1x128xf32, #tpu.memory_space<vmem>>, vector<1x128xf32>
    %27 = vector.broadcast %26 : vector<1x128xf32> to vector<8x128xf32>
    %28 = arith.mulf %25, %27 : vector<8x128xf32>
    %c0_13 = arith.constant 0 : index
    %c0_14 = arith.constant 0 : index
    %29 = vector.load %arg5[%c0_13, %c0_14] : memref<1x128xf32, #tpu.memory_space<vmem>>, vector<1x128xf32>
    %30 = vector.broadcast %29 : vector<1x128xf32> to vector<8x128xf32>
    %31 = arith.addf %28, %30 : vector<8x128xf32>
    %32 = math.tanh %31 : vector<8x128xf32>
    %33 = arith.truncf %32 : vector<8x128xf32> to vector<8x128xbf16>
    %c0_15 = arith.constant 0 : index
    %c0_16 = arith.constant 0 : index
    %34 = vector.load %arg6[%c0_15, %c0_16] : memref<128x128xbf16, #tpu.memory_space<vmem>>, vector<128x128xbf16>
    %cst_17 = arith.constant dense<0.000000e+00> : vector<8x128xf32>
    %35 = tpu.matmul %33, %34, %cst_17 {dimension_numbers = #tpu.dot_dimension_numbers<[1], [0], [0], [1], [0, 0, 1, 1], [], []>} : vector<8x128xbf16>, vector<128x128xbf16>, vector<8x128xf32> -> vector<8x128xf32>
    %c0_18 = arith.constant 0 : index
    %c0_19 = arith.constant 0 : index
    %36 = vector.load %arg7[%c0_18, %c0_19] : memref<1x128xf32, #tpu.memory_space<vmem>>, vector<1x128xf32>
    %37 = vector.broadcast %36 : vector<1x128xf32> to vector<8x128xf32>
    %38 = arith.addf %35, %37 : vector<8x128xf32>
    %cst_20 = arith.constant 0.000000e+00 : f32
    %39 = vector.broadcast %cst_20 : f32 to vector<8x128xf32>
    %40 = arith.maximumf %38, %39 : vector<8x128xf32>
    %41 = arith.truncf %40 : vector<8x128xf32> to vector<8x128xbf16>
    %c0_21 = arith.constant 0 : index
    %c0_22 = arith.constant 0 : index
    %42 = vector.load %arg8[%c0_21, %c0_22] : memref<128x256xbf16, #tpu.memory_space<vmem>>, vector<128x256xbf16>
    %cst_23 = arith.constant dense<0.000000e+00> : vector<8x256xf32>
    %43 = tpu.matmul %41, %42, %cst_23 {dimension_numbers = #tpu.dot_dimension_numbers<[1], [0], [0], [1], [0, 0, 1, 1], [], []>} : vector<8x128xbf16>, vector<128x256xbf16>, vector<8x256xf32> -> vector<8x256xf32>
    %c0_24 = arith.constant 0 : index
    %c0_25 = arith.constant 0 : index
    %44 = vector.load %arg9[%c0_24, %c0_25] : memref<1x256xf32, #tpu.memory_space<vmem>>, vector<1x256xf32>
    %45 = vector.broadcast %44 : vector<1x256xf32> to vector<8x256xf32>
    %46 = arith.addf %43, %45 : vector<8x256xf32>
    %47 = tpu.iota {dimensions = array<i32: 1>} : vector<8x256xi32>
    %48 = math.tanh %46 : vector<8x256xf32>
    %cst_26 = arith.constant -1.000000e+01 : f32
    %cst_27 = arith.constant 2.000000e+00 : f32
    %49 = vector.broadcast %cst_26 : f32 to vector<8x256xf32>
    %50 = arith.maximumf %49, %46 : vector<8x256xf32>
    %51 = vector.broadcast %cst_27 : f32 to vector<8x256xf32>
    %52 = arith.minimumf %51, %50 : vector<8x256xf32>
    %53 = math.exp %52 : vector<8x256xf32>
    %c128_i32 = arith.constant 128 : i32
    %54 = vector.broadcast %c128_i32 : i32 to vector<8x256xi32>
    %55 = arith.cmpi slt, %47, %54 : vector<8x256xi32>
    %56 = arith.select %55, %48, %53 : vector<8x256xi1>, vector<8x256xf32>
    %c0_28 = arith.constant 0 : index
    %c0_29 = arith.constant 0 : index
    %57 = vector.load %arg10[%c0_28, %c0_29] : memref<8x256xf32, #tpu.memory_space<vmem>>, vector<8x256xf32>
    tpu.vector_store %arg10[%c0_28, %c0_29], %56 {strides = array<i32>} : memref<8x256xf32, #tpu.memory_space<vmem>>, vector<8x256xf32>,
    return
  }
  func.func @transform_0(%arg0: i32) -> (i32, i32) {
    %c0_i32 = arith.constant 0 : i32
    %c0_i32_0 = arith.constant 0 : i32
    return %arg0, %c0_i32 : i32, i32
  }
  func.func @transform_1(%arg0: i32) -> (i32, i32) {
    %c0_i32 = arith.constant 0 : i32
    %c0_i32_0 = arith.constant 0 : i32
    %c0_i32_1 = arith.constant 0 : i32
    return %c0_i32, %c0_i32_0 : i32, i32
  }
  func.func @transform_2(%arg0: i32) -> (i32, i32) {
    %c0_i32 = arith.constant 0 : i32
    %c0_i32_0 = arith.constant 0 : i32
    %c0_i32_1 = arith.constant 0 : i32
    return %c0_i32, %c0_i32_0 : i32, i32
  }
  func.func @transform_3(%arg0: i32) -> (i32, i32) {
    %c0_i32 = arith.constant 0 : i32
    %c0_i32_0 = arith.constant 0 : i32
    %c0_i32_1 = arith.constant 0 : i32
    return %c0_i32, %c0_i32_0 : i32, i32
  }
  func.func @transform_4(%arg0: i32) -> (i32, i32) {
    %c0_i32 = arith.constant 0 : i32
    %c0_i32_0 = arith.constant 0 : i32
    %c0_i32_1 = arith.constant 0 : i32
    return %c0_i32, %c0_i32_0 : i32, i32
  }
  func.func @transform_5(%arg0: i32) -> (i32, i32) {
    %c0_i32 = arith.constant 0 : i32
    %c0_i32_0 = arith.constant 0 : i32
    %c0_i32_1 = arith.constant 0 : i32
    return %c0_i32, %c0_i32_0 : i32, i32
  }
  func.func @transform_6(%arg0: i32) -> (i32, i32) {
    %c0_i32 = arith.constant 0 : i32
    %c0_i32_0 = arith.constant 0 : i32
    %c0_i32_1 = arith.constant 0 : i32
    return %c0_i32, %c0_i32_0 : i32, i32
  }
  func.func @transform_7(%arg0: i32) -> (i32, i32) {
    %c0_i32 = arith.constant 0 : i32
    %c0_i32_0 = arith.constant 0 : i32
    %c0_i32_1 = arith.constant 0 : i32
    return %c0_i32, %c0_i32_0 : i32, i32
  }
  func.func @transform_8(%arg0: i32) -> (i32, i32) {
    %c0_i32 = arith.constant 0 : i32
    %c0_i32_0 = arith.constant 0 : i32
    %c0_i32_1 = arith.constant 0 : i32
    return %c0_i32, %c0_i32_0 : i32, i32
  }
  func.func @transform_9(%arg0: i32) -> (i32, i32) {
    %c0_i32 = arith.constant 0 : i32
    %c0_i32_0 = arith.constant 0 : i32
    return %arg0, %c0_i32 : i32, i32
  }
}

module attributes {stable_mosaic.version = 11 : i64} {
  func.func @actor_kernel(%arg0: i32, %arg1: memref<8x12xbf16, #tpu.memory_space<vmem>>, %arg2: memref<12x128xbf16, #tpu.memory_space<vmem>>, %arg3: memref<1x128xf32, #tpu.memory_space<vmem>>, %arg4: memref<1x128xf32, #tpu.memory_space<vmem>>, %arg5: memref<1x128xf32, #tpu.memory_space<vmem>>, %arg6: memref<128x128xbf16, #tpu.memory_space<vmem>>, %arg7: memref<1x128xf32, #tpu.memory_space<vmem>>, %arg8: memref<128x256xbf16, #tpu.memory_space<vmem>>, %arg9: memref<1x256xf32, #tpu.memory_space<vmem>>, %arg10: memref<8x256xf32, #tpu.memory_space<vmem>>) attributes {dimension_semantics = [#tpu.dimension_semantics<parallel>], iteration_bounds = array<i64: 1>, scalar_prefetch = 0 : i64, scratch_operands = 0 : i64, tpu.core_type = #tpu.core_type<tc>, window_params = [{transform_indices = @transform_0, window_bounds = array<i64: 8, 12>}, {pipeline_mode = #tpu.pipeline_mode<synchronous>, transform_indices = @transform_1, window_bounds = array<i64: 12, 128>}, {pipeline_mode = #tpu.pipeline_mode<synchronous>, transform_indices = @transform_2, window_bounds = array<i64: 1, 128>}, {pipeline_mode = #tpu.pipeline_mode<synchronous>, transform_indices = @transform_3, window_bounds = array<i64: 1, 128>}, {pipeline_mode = #tpu.pipeline_mode<synchronous>, transform_indices = @transform_4, window_bounds = array<i64: 1, 128>}, {pipeline_mode = #tpu.pipeline_mode<synchronous>, transform_indices = @transform_5, window_bounds = array<i64: 128, 128>}, {pipeline_mode = #tpu.pipeline_mode<synchronous>, transform_indices = @transform_6, window_bounds = array<i64: 1, 128>}, {pipeline_mode = #tpu.pipeline_mode<synchronous>, transform_indices = @transform_7, window_bounds = array<i64: 128, 256>}, {pipeline_mode = #tpu.pipeline_mode<synchronous>, transform_indices = @transform_8, window_bounds = array<i64: 1, 256>}, {transform_indices = @transform_9, window_bounds = array<i64: 8, 256>}]} {
    %c0 = arith.constant 0 : index
    %c0_0 = arith.constant 0 : index
    %0 = vector.load %arg1[%c0, %c0_0] : memref<8x12xbf16, #tpu.memory_space<vmem>>, vector<8x12xbf16>
    %c0_1 = arith.constant 0 : index
    %c0_2 = arith.constant 0 : index
    %1 = vector.load %arg2[%c0_1, %c0_2] : memref<12x128xbf16, #tpu.memory_space<vmem>>, vector<12x128xbf16>
    %cst = arith.constant dense<0.000000e+00> : vector<8x128xf32>
    %2 = tpu.matmul %0, %1, %cst {dimension_numbers = #tpu.dot_dimension_numbers<[1], [0], [0], [1], [0, 0, 1, 1], [], []>} : vector<8x12xbf16>, vector<12x128xbf16>, vector<8x128xf32> -> vector<8x128xf32>
    %c0_3 = arith.constant 0 : index
    %c0_4 = arith.constant 0 : index
    %3 = vector.load %arg3[%c0_3, %c0_4] : memref<1x128xf32, #tpu.memory_space<vmem>>, vector<1x128xf32>
    %4 = vector.broadcast %3 : vector<1x128xf32> to vector<8x128xf32>
    %5 = arith.addf %2, %4 : vector<8x128xf32>
    %cst_5 = arith.constant dense<0.000000e+00> : vector<8xf32>
    %6 = vector.multi_reduction <add>, %5, %cst_5 [1] : vector<8x128xf32> to vector<8xf32>
    %7 = vector.shape_cast %6 : vector<8xf32> to vector<8x1xf32>
    %8 = arith.mulf %5, %5 : vector<8x128xf32>
    %cst_6 = arith.constant dense<0.000000e+00> : vector<8xf32>
    %9 = vector.multi_reduction <add>, %8, %cst_6 [1] : vector<8x128xf32> to vector<8xf32>
    %10 = vector.shape_cast %9 : vector<8xf32> to vector<8x1xf32>
    %cst_7 = arith.constant 3.125000e-02 : f32
    %11 = vector.broadcast %cst_7 : f32 to vector<8x1xf32>
    %12 = arith.mulf %7, %11 : vector<8x1xf32>
    %cst_8 = arith.constant 3.125000e-02 : f32
    %13 = vector.broadcast %cst_8 : f32 to vector<8x1xf32>
    %14 = arith.mulf %10, %13 : vector<8x1xf32>
    %15 = arith.mulf %12, %12 : vector<8x1xf32>
    %16 = arith.subf %14, %15 : vector<8x1xf32>
    %cst_9 = arith.constant 0.000000e+00 : f32
    %17 = vector.broadcast %cst_9 : f32 to vector<8x1xf32>
    %18 = arith.maximumf %16, %17 : vector<8x1xf32>
    %19 = vector.broadcast %12 : vector<8x1xf32> to vector<8x128xf32>
    %20 = arith.subf %5, %19 : vector<8x128xf32>
    %cst_10 = arith.constant 9.99999974E-6 : f32
    %21 = vector.broadcast %cst_10 : f32 to vector<8x1xf32>
    %22 = arith.addf %18, %21 : vector<8x1xf32>
    %23 = math.rsqrt %22 : vector<8x1xf32>
    %24 = vector.broadcast %23 : vector<8x1xf32> to vector<8x128xf32>
    %25 = arith.mulf %20, %24 : vector<8x128xf32>
    %c0_11 = arith.constant 0 : index
    %c0_12 = arith.constant 0 : index
    %26 = vector.load %arg4[%c0_11, %c0_12] : memref<1x128xf32, #tpu.memory_space<vmem>>, vector<1x128xf32>
    %27 = vector.broadcast %26 : vector<1x128xf32> to vector<8x128xf32>
    %28 = arith.mulf %25, %27 : vector<8x128xf32>
    %c0_13 = arith.constant 0 : index
    %c0_14 = arith.constant 0 : index
    %29 = vector.load %arg5[%c0_13, %c0_14] : memref<1x128xf32, #tpu.memory_space<vmem>>, vector<1x128xf32>
    %30 = vector.broadcast %29 : vector<1x128xf32> to vector<8x128xf32>
    %31 = arith.addf %28, %30 : vector<8x128xf32>
    %32 = math.tanh %31 : vector<8x128xf32>
    %33 = arith.truncf %32 : vector<8x128xf32> to vector<8x128xbf16>
    %c0_15 = arith.constant 0 : index
    %c0_16 = arith.constant 0 : index
    %34 = vector.load %arg6[%c0_15, %c0_16] : memref<128x128xbf16, #tpu.memory_space<vmem>>, vector<128x128xbf16>
    %cst_17 = arith.constant dense<0.000000e+00> : vector<8x128xf32>
    %35 = tpu.matmul %33, %34, %cst_17 {dimension_numbers = #tpu.dot_dimension_numbers<[1], [0], [0], [1], [0, 0, 1, 1], [], []>} : vector<8x128xbf16>, vector<128x128xbf16>, vector<8x128xf32> -> vector<8x128xf32>
    %c0_18 = arith.constant 0 : index
    %c0_19 = arith.constant 0 : index
    %36 = vector.load %arg7[%c0_18, %c0_19] : memref<1x128xf32, #tpu.memory_space<vmem>>, vector<1x128xf32>
    %37 = vector.broadcast %36 : vector<1x128xf32> to vector<8x128xf32>
    %38 = arith.addf %35, %37 : vector<8x128xf32>
    %cst_20 = arith.constant 0.000000e+00 : f32
    %39 = vector.broadcast %cst_20 : f32 to vector<8x128xf32>
    %40 = arith.maximumf %38, %39 : vector<8x128xf32>
    %41 = arith.truncf %40 : vector<8x128xf32> to vector<8x128xbf16>
    %c0_21 = arith.constant 0 : index
    %c0_22 = arith.constant 0 : index
    %42 = vector.load %arg8[%c0_21, %c0_22] : memref<128x256xbf16, #tpu.memory_space<vmem>>, vector<128x256xbf16>
    %cst_23 = arith.constant dense<0.000000e+00> : vector<8x256xf32>
    %43 = tpu.matmul %41, %42, %cst_23 {dimension_numbers = #tpu.dot_dimension_numbers<[1], [0], [0], [1], [0, 0, 1, 1], [], []>} : vector<8x128xbf16>, vector<128x256xbf16>, vector<8x256xf32> -> vector<8x256xf32>
    %c0_24 = arith.constant 0 : index
    %c0_25 = arith.constant 0 : index
    %44 = vector.load %arg9[%c0_24, %c0_25] : memref<1x256xf32, #tpu.memory_space<vmem>>, vector<1x256xf32>
    %45 = vector.broadcast %44 : vector<1x256xf32> to vector<8x256xf32>
    %46 = arith.addf %43, %45 : vector<8x256xf32>
    %47 = tpu.iota {dimensions = array<i32: 1>} : vector<8x256xi32>
    %48 = math.tanh %46 : vector<8x256xf32>
    %cst_26 = arith.constant -1.000000e+01 : f32
    %cst_27 = arith.constant 2.000000e+00 : f32
    %49 = vector.broadcast %cst_26 : f32 to vector<8x256xf32>
    %50 = arith.maximumf %49, %46 : vector<8x256xf32>
    %51 = vector.broadcast %cst_27 : f32 to vector<8x256xf32>
    %52 = arith.minimumf %51, %50 : vector<8x256xf32>
    %53 = math.exp %52 : vector<8x256xf32>
    %c128_i32 = arith.constant 128 : i32
    %54 = vector.broadcast %c128_i32 : i32 to vector<8x256xi32>
    %55 = arith.cmpi slt, %47, %54 : vector<8x256xi32>
    %56 = arith.select %55, %48, %53 : vector<8x256xi1>, vector<8x256xf32>
    %c0_28 = arith.constant 0 : index
    %c0_29 = arith.constant 0 : index
    %57 = vector.load %arg10[%c0_28, %c0_29] : memref<8x256xf32, #tpu.memory_space<vmem>>, vector<8x256xf32>
    tpu.vector_store %arg10[%c0_28, %c0_29], %56 {strides = array<i32>} : memref<8x256xf32, #tpu.memory_space<vmem>>, vector<8x256xf32>,
    return
  }
  func.func @transform_0(%arg0: i32) -> (i32, i32) {
    %c0_i32 = arith.constant 0 : i32
    %c0_i32_0 = arith.constant 0 : i32
    return %arg0, %c0_i32 : i32, i32
  }
  func.func @transform_1(%arg0: i32) -> (i32, i32) {
    %c0_i32 = arith.constant 0 : i32
    %c0_i32_0 = arith.constant 0 : i32
    %c0_i32_1 = arith.constant 0 : i32
    return %c0_i32, %c0_i32_0 : i32, i32
  }
  func.func @transform_2(%arg0: i32) -> (i32, i32) {
    %c0_i32 = arith.constant 0 : i32
    %c0_i32_0 = arith.constant 0 : i32
    %c0_i32_1 = arith.constant 0 : i32
    return %c0_i32, %c0_i32_0 : i32, i32
  }
  func.func @transform_3(%arg0: i32) -> (i32, i32) {
    %c0_i32 = arith.constant 0 : i32
    %c0_i32_0 = arith.constant 0 : i32
    %c0_i32_1 = arith.constant 0 : i32
    return %c0_i32, %c0_i32_0 : i32, i32
  }
  func.func @transform_4(%arg0: i32) -> (i32, i32) {
    %c0_i32 = arith.constant 0 : i32
    %c0_i32_0 = arith.constant 0 : i32
    %c0_i32_1 = arith.constant 0 : i32
    return %c0_i32, %c0_i32_0 : i32, i32
  }
  func.func @transform_5(%arg0: i32) -> (i32, i32) {
    %c0_i32 = arith.constant 0 : i32
    %c0_i32_0 = arith.constant 0 : i32
    %c0_i32_1 = arith.constant 0 : i32
    return %c0_i32, %c0_i32_0 : i32, i32
  }
  func.func @transform_6(%arg0: i32) -> (i32, i32) {
    %c0_i32 = arith.constant 0 : i32
    %c0_i32_0 = arith.constant 0 : i32
    %c0_i32_1 = arith.constant 0 : i32
    return %c0_i32, %c0_i32_0 : i32, i32
  }
  func.func @transform_7(%arg0: i32) -> (i32, i32) {
    %c0_i32 = arith.constant 0 : i32
    %c0_i32_0 = arith.constant 0 : i32
    %c0_i32_1 = arith.constant 0 : i32
    return %c0_i32, %c0_i32_0 : i32, i32
  }
  func.func @transform_8(%arg0: i32) -> (i32, i32) {
    %c0_i32 = arith.constant 0 : i32
    %c0_i32_0 = arith.constant 0 : i32
    %c0_i32_1 = arith.constant 0 : i32
    return %c0_i32, %c0_i32_0 : i32, i32
  }
  func.func @transform_9(%arg0: i32) -> (i32, i32) {
    %c0_i32 = arith.constant 0 : i32
    %c0_i32_0 = arith.constant 0 : i32
    return %arg0, %c0_i32 : i32, i32
  }
}

</mosaic_0001>

<bundles_post_ra>
// kernel: tpu_custom_call.1
= control target key start
LH: loop header
LB: loop body
LE: loop exit
PB: predicated region body
PF: predicated region fallthrough
CT: control target
= control target key end

     0   :  { %14 = vsyncpa [#allocation3], 0  ;;  %s875_s0 = inlined_call_operand.hbm [shape: bf16[8,12], index: 0, kind: input, shape index: {}]   ;;  %s876_s1 = inlined_call_operand.hbm [shape: bf16[12,128], index: 1, kind: input, shape index: {}]   ;;  %s877_s2 = inlined_call_operand.vmem [shape: f32[1,128], index: 2, kind: input, shape index: {}]   ;;  %s878_s3 = inlined_call_operand.hbm [shape: f32[1,128], index: 3, kind: input, shape index: {}]   ;;  %s879_s4 = inlined_call_operand.hbm [shape: f32[1,128], index: 4, kind: input, shape index: {}]   ;;  %s880_s5 = inlined_call_operand.hbm [shape: bf16[128,128], index: 5, kind: input, shape index: {}]   ;;  %s881_s6 = inlined_call_operand.vmem [shape: f32[1,128], index: 6, kind: input, shape index: {}]   ;;  %s882_s7 = inlined_call_operand.hbm [shape: bf16[128,256], index: 7, kind: input, shape index: {}]   ;;  %s883_s8 = inlined_call_operand.vmem [shape: f32[1,256], index: 8, kind: input, shape index: {}]   ;;  %s884_s9 = inlined_call_operand.hbm [shape: f32[8,256], index: 9, kind: output, shape index: {}]  }
   0x1   :  { %15 = vsyncpa [#allocation6], 0 }
   0x2   :  { %16 = vsyncpa [#allocation9], 0 }
   0x3   :  { %17 = vsyncpa [#allocation12], 0  ;;  %s34_s11 = sshll.u32 %s876_s1, 4  ;;  %s35_s11 = int_to_ptr.hbm [resolvable:$true] %s34_s11 }
   0x4   :  { %18 = vsyncpa [#allocation4], 0  ;;  %s767_s12 = smov [#allocation5]   ;;  %s61_s16 = sshll.u32 %s879_s4, 4  ;;  %s62_s16 = int_to_ptr.hbm [resolvable:$true] %s61_s16 }
   0x5   :  { %s36_s13 = sshll.u32 %s767_s12, 4  ;;  %s768_s17 = smov 64   ;;  %s37_s13 = int_to_ptr.vmem [resolvable:$true] %s36_s13 }
   0x6   :  { %s769_s18 = smov 4   ;;  %s770_s19 = smov [#allocation8]  }
   0x7   :  { %42 = dma.hbm_to_vmem [thread:$0]  %s35_s11, 128, %s37_s13, [#allocation6], %s768_s17, %s768_s17, %s769_s18  }
   0x8   :  { %s63_s20 = sshll.u32 %s770_s19, 4  ;;  %s24_s22 = sshll.u32 %s875_s0, 4  ;;  %s64_s20 = int_to_ptr.vmem [resolvable:$true] %s63_s20  ;;  %s25_s22 = int_to_ptr.hbm [resolvable:$true] %s24_s22 }
   0x9   :  { %66 = dma.hbm_to_vmem [thread:$0]  %s62_s16, 16, %s64_s20, [#allocation9]  }
   0xa   :  { %s50_s4 = sshll.u32 %s878_s3, 4  ;;  %s771_s25 = smov [#allocation2]   ;;  %s51_s4 = int_to_ptr.hbm [resolvable:$true] %s50_s4 }
   0xb   :  { %s26_s26 = sshll.u32 %s771_s25, 4  ;;  %s772_s27 = smov [#allocation7]   ;;  %s27_s26 = int_to_ptr.vmem [resolvable:$true] %s26_s26 }
   0xc   :  { %29 = dma.hbm_to_vmem [thread:$0]  %s25_s22, 64, %s27_s26, [#allocation3]  }
   0xd   :  { %s52_s28 = sshll.u32 %s772_s27, 4  ;;  %s71_s10 = sshll.u32 %s880_s5, 4  ;;  %s53_s28 = int_to_ptr.vmem [resolvable:$true] %s52_s28  ;;  %s72_s10 = int_to_ptr.hbm [resolvable:$true] %s71_s10 }
   0xe   :  { %55 = dma.hbm_to_vmem [thread:$0]  %s51_s4, 16, %s53_s28, [#allocation6]  }
   0xf   :  { %s86_s12 = sshll.u32 %s882_s7, 4  ;;  %s773_s13 = smov [#allocation10]   ;;  %s87_s12 = int_to_ptr.hbm [resolvable:$true] %s86_s12 }
  0x10   :  { %s73_s3 = sshll.u32 %s773_s13, 4  ;;  %s774_s14 = smov [#allocation11]   ;;  %s74_s3 = int_to_ptr.vmem [resolvable:$true] %s73_s3 }
  0x11   :  { %79 = dma.hbm_to_vmem [thread:$0]  %s72_s10, 1024, %s74_s3, [#allocation9], %s768_s17, %s768_s17, %s769_s18  }
  0x12   :  { %s88_s15 = sshll.u32 %s774_s14, 4  ;;  %s775_s16 = smov 128   ;;  %s89_s15 = int_to_ptr.vmem [resolvable:$true] %s88_s15 }
  0x13   :  { %s776_s5 = smov 8  }
  0x14   :  { %94 = dma.hbm_to_vmem [thread:$0]  %s87_s12, 2048, %s89_s15, [#allocation12], %s775_s16, %s775_s16, %s776_s5  }
  0x15   :  { %757 = dma.done.wait [#allocation3], 64  }
  0x16   :  { %758 = vsyncadd [#allocation3], 4294967232 }
  0x17   :  { %759 = dma.done.wait [#allocation6], 144  }
  0x18   :  { %760 = vsyncadd [#allocation6], 4294967152 }
  0x19   :  { %761 = dma.done.wait [#allocation9], 1040  }
  0x1a   :  { %762 = vsyncadd [#allocation9], 4294966256 }
  0x1b   :  { %763 = dma.done.wait [#allocation12], 2048  }
  0x1c   :  { %764 = vsyncadd [#allocation12], 4294965248  ;;  %v442_v0 = vld [vmem:[#allocation5] sm:$0xf]  ;;  %v541_v1 = vld [vmem:[#allocation5] sm:$0x30] }
  0x1d   :  { %vm138_vm0 = vcmask 1045504   ;;  %v443_v2 = vor.u32 %v541_v1, %v442_v0  ;;  %v122_v4 = vld [vmem:[#allocation2] sm:$0xf]  ;;  %vm134_vm1 = vcmask 97280   ;;  %v549_v10 = vld [vmem:[#allocation10 + $0x38] sm:$0xff]  ;;  %v547_v12 = vld [vmem:[#allocation10 + $0x28] sm:$0xff] }
  0x1e   :  { %v577_v5 = vld [vmem:[%s877_s2] ss:$0 sm:$0xff]  ;;  %258 = vmatpush.bf16.msra.mxu1 %v549_v10  ;;  %v546_v13 = vld [vmem:[#allocation10 + $0x20] sm:$0xff]  ;;  %v545_v15 = vld [vmem:[#allocation10 + $0x18] sm:$0xff] }
  0x1f   :  { %v140_v3 = vsel %vm138_vm0, %v443_v2, 0  ;;  %v548_v11 = vld [vmem:[#allocation10 + $0x30] sm:$0xff]  ;;  %v543_v18 = vld [vmem:[#allocation10 + $0x8] sm:$0xff]  ;;  %v542_v23 = vld [vmem:[#allocation10] sm:$0xff] }
  0x20   :  { %149 = vmatpush.bf16.msra.mxu0 %v140_v3  ;;  %v544_v16 = vld [vmem:[#allocation10 + $0x10] sm:$0xff]  ;;  %v565_v27 = vld [vmem:[#allocation11 + $0x74] sm:$0xf0]  ;;  %v537_v30 = vld [vmem:[#allocation11 + $0x78] sm:$0xf0] }
  0x21   :  { %v535_v26 = vld [vmem:[#allocation11 + $0x70] sm:$0xf]  ;;  %v564_v28 = vld [vmem:[#allocation11 + $0x74] sm:$0xf]  ;;  %v527_v31 = vld [vmem:[#allocation11 + $0x60] sm:$0xf] }
  0x22   :  { %259 = vmatpush.bf16.msra.mxu1 %v548_v11  ;;  %v536_v29 = vor.u32 %v565_v27, %v535_v26  ;;  %v563_v32 = vld [vmem:[#allocation11 + $0x64] sm:$0xf0]  ;;  %v540_v33 = vor.u32 %v564_v28, %v537_v30  ;;  %v562_v34 = vld [vmem:[#allocation11 + $0x64] sm:$0xf]  ;;  %v529_v35 = vld [vmem:[#allocation11 + $0x68] sm:$0xf0] }
  0x23   :  { %444 = vmatmul.msk.bf16.vlgmr.msra.gmra.mxu0 %vm134_vm1, %v122_v4  ;;  %v528_v36 = vor.u32 %v563_v32, %v527_v31  ;;  %v532_v37 = vor.u32 %v562_v34, %v529_v35  ;;  %v519_v38 = vld [vmem:[#allocation11 + $0x50] sm:$0xf]  ;;  %v561_v39 = vld [vmem:[#allocation11 + $0x54] sm:$0xf0]  ;;  %v560_v41 = vld [vmem:[#allocation11 + $0x54] sm:$0xf] }
  0x24   :  { %375 = vmatpush.bf16.msra.mxu2 %v536_v29  ;;  %388 = vmatpush.bf16.msra.mxu3 %v540_v33  ;;  %v521_v42 = vld [vmem:[#allocation11 + $0x58] sm:$0xf0]  ;;  %v520_v44 = vor.u32 %v561_v39, %v519_v38  ;;  %v511_v47 = vld [vmem:[#allocation11 + $0x40] sm:$0xf]  ;;  %v559_v48 = vld [vmem:[#allocation11 + $0x44] sm:$0xf0] }
  0x25   :  { %v524_v46 = vor.u32 %v560_v41, %v521_v42  ;;  %v558_v49 = vld [vmem:[#allocation11 + $0x44] sm:$0xf]  ;;  %v513_v50 = vld [vmem:[#allocation11 + $0x48] sm:$0xf0]  ;;  %v512_v52 = vor.u32 %v559_v48, %v511_v47  ;;  %v503_v55 = vld [vmem:[#allocation11 + $0x30] sm:$0xf] }
  0x26   :  { %260 = vmatpush.bf16.msra.mxu1 %v547_v12  ;;  %v516_v54 = vor.u32 %v558_v49, %v513_v50  ;;  %v557_v56 = vld [vmem:[#allocation11 + $0x34] sm:$0xf0]  ;;  %v556_v57 = vld [vmem:[#allocation11 + $0x34] sm:$0xf]  ;;  %v505_v58 = vld [vmem:[#allocation11 + $0x38] sm:$0xf0] }
  0x27   :  { %v578_v61 = vld [vmem:[#allocation7] ss:$0 sm:$0xff]  ;;  %v504_v62 = vor.u32 %v557_v56, %v503_v55  ;;  %v508_v0 = vor.u32 %v556_v57, %v505_v58  ;;  %v495_v1 = vld [vmem:[#allocation11 + $0x20] sm:$0xf]  ;;  %v555_v2 = vld [vmem:[#allocation11 + $0x24] sm:$0xf0] }
  0x28   :  { %376 = vmatpush.bf16.msra.mxu2 %v528_v36  ;;  %389 = vmatpush.bf16.msra.mxu3 %v532_v37  ;;  %v579_v4 = vld [vmem:[#allocation8] ss:$0 sm:$0xff]  ;;  %v289_v31 = vld [vmem:[%s883_s8] sm:$0x3]  ;;  %s427_s8 = sshll.u32 %s884_s9, 4  ;;  %s428_s8 = int_to_ptr.hbm [resolvable:$true] %s427_s8 }
  0x29   :  { %v291_v32 = vperm.slane %v289_v31, 0  ;;  %v292_v33 = vperm.slane %v289_v31, 1 }
  0x2a   :  { %261 = vmatpush.bf16.msra.mxu1 %v546_v13  ;;  %v487_v13 = vld [vmem:[#allocation11 + $0x10] sm:$0xf] }
  0x2c   :  { %377 = vmatpush.bf16.msra.mxu2 %v520_v44  ;;  %390 = vmatpush.bf16.msra.mxu3 %v524_v46 }
  0x2e   :  { %262 = vmatpush.bf16.msra.mxu1 %v545_v15  ;;  %v552_v15 = vld [vmem:[#allocation11 + $0x14] sm:$0xf] }
  0x30   :  { %378 = vmatpush.bf16.msra.mxu2 %v512_v52  ;;  %391 = vmatpush.bf16.msra.mxu3 %v516_v54 }
  0x32   :  { %263 = vmatpush.bf16.msra.mxu1 %v544_v16 }
  0x34   :  { %379 = vmatpush.bf16.msra.mxu2 %v504_v62  ;;  %392 = vmatpush.bf16.msra.mxu3 %v508_v0 }
  0x36   :  { %264 = vmatpush.bf16.msra.mxu1 %v543_v18 }
  0x3a   :  { %265 = vmatpush.bf16.msra.mxu1 %v542_v23  ;;  %v481_v23 = vld [vmem:[#allocation11 + $0x8] sm:$0xf0] }
  0xa0   :  { %v151_v6 = vpop.f32.mrf.mxu0 }
  0xa1   :  { %v855_v7 = vadd.f32 %v577_v5, %v151_v6  ;;  %v554_v5 = vld [vmem:[#allocation11 + $0x24] sm:$0xf]  ;;  %v497_v6 = vld [vmem:[#allocation11 + $0x28] sm:$0xf0] }
  0xa2   :  { %v500_v10 = vor.u32 %v554_v5, %v497_v6 }
  0xa3   :  { %155 = vadd.xlane.f32.xlu0 %v855_v7  ;;  %v157_v9 = vmul.f32 %v855_v7, %v855_v7 }
  0xa4   :  { %393 = vmatpush.bf16.msra.mxu3 %v500_v10 }
  0xa8   :  { %v153_v8 = vpop.f32.mrf.mxu0 }
  0xab   :  { %158 = vadd.xlane.f32.xlu0 %v157_v9  ;;  %v496_v9 = vor.u32 %v555_v2, %v495_v1 }
  0xad   :  { %380 = vmatpush.bf16.msra.mxu2 %v496_v9 }
 0x116   :  { %v156_v14 = vpop.xlane.xlu0 %155 }
 0x117   :  { %v860_v17 = vmul.f32 0.03125, %v156_v14  ;;  %v553_v14 = vld [vmem:[#allocation11 + $0x14] sm:$0xf0] }
 0x118   :  { %v488_v16 = vor.u32 %v553_v14, %v487_v13 }
 0x119   :  { %v162_v20 = vmul.f32 %v860_v17, %v860_v17  ;;  %v165_v60 = vsub.f32 %v855_v7, %v860_v17  ;;  %v489_v17 = vld [vmem:[#allocation11 + $0x18] sm:$0xf0] }
 0x11a   :  { %v492_v18 = vor.u32 %v552_v15, %v489_v17  ;;  %381 = vmatpush.bf16.msra.mxu2 %v488_v16 }
 0x11c   :  { %394 = vmatpush.bf16.msra.mxu3 %v492_v18 }
 0x11e   :  { %v159_v19 = vpop.xlane.xlu0 %158 }
 0x11f   :  { %v161_v21 = vmul.f32 0.03125, %v159_v19  ;;  %v479_v19 = vld [vmem:[#allocation11] sm:$0xf] }
 0x121   :  { %v163_v22 = vsub.f32 %v161_v21, %v162_v20  ;;  %v551_v20 = vld [vmem:[#allocation11 + $0x4] sm:$0xf0]  ;;  %v550_v21 = vld [vmem:[#allocation11 + $0x4] sm:$0xf] }
 0x123   :  { %v164_v24 = vmax.f32 %v163_v22, 0.0  ;;  %v480_v22 = vor.u32 %v551_v20, %v479_v19 }
 0x125   :  { %v166_v25 = vadd.f32 1e-05, %v164_v24  ;;  %v484_v24 = vor.u32 %v550_v21, %v481_v23  ;;  %382 = vmatpush.bf16.msra.mxu2 %v480_v22 }
 0x127   :  { %581 = vrsqrt.f32 %v166_v25  ;;  %vm173_vm3 = vweird.f32 %v166_v25  ;;  %395 = vmatpush.bf16.msra.mxu3 %v484_v24 }
 0x12d   :  { %v582_v40 = vpop.eup %581 }
 0x12e   :  { %v168_v43 = vmul.f32 %v582_v40, %v166_v25  ;;  %vm174_vm2 = vweird.f32 %v582_v40  ;;  %v580_v25 = vld [vmem:[%s881_s6] ss:$0 sm:$0xff]  ;;  %s777_s6 = smov [#allocation13]  }
 0x12f   :  { %vm175_vm4 = vmor %vm173_vm3, %vm174_vm2  ;;  %s425_s21 = sshll.u32 %s777_s6, 4  ;;  %s426_s21 = int_to_ptr.vmem [resolvable:$true] %s425_s21 }
 0x130   :  { %v169_v45 = vmul.f32 %v582_v40, %v168_v43 }
 0x132   :  { %v170_v51 = vmul.f32 0.5, %v169_v45 }
 0x134   :  { %v171_v53 = vsub.f32 1.5, %v170_v51 }
 0x136   :  { %v172_v59 = vmul.f32 %v582_v40, %v171_v53 }
 0x138   :  { %v176_v63 = vsel %vm175_vm4, %v582_v40, %v172_v59 }
 0x139   :  { %v177_v3 = vmul.f32 %v176_v63, %v165_v60 }
 0x13b   :  { %v182_v8 = vmul.f32 %v578_v61, %v177_v3 }
 0x13d   :  { %v187_v11 = vadd.f32 %v579_v4, %v182_v8 }
 0x13f   :  { %583 = vtanh.f32 %v187_v11 }
 0x145   :  { %v584_v7 = vpop.eup %583 }
 0x146   :  { %v189_v12 = vpack.c.bf16 %v584_v7, %v584_v7 }
 0x148   :  { %266 = vmatmul.bf16.vlgmr.msra.gmra.mxu1 %v189_v12 }
 0x1c5   :  { %v267_v26 = vpop.f32.mrf.mxu1 }
 0x1c6   :  { %v268_v27 = vadd.f32 %v580_v25, %v267_v26 }
 0x1c8   :  { %v271_v28 = vmax.f32 %v268_v27, 0.0 }
 0x1ca   :  { %v272_v29 = vpack.c.bf16 %v271_v28, %v271_v28 }
 0x1cc   :  { %383 = vmatmul.bf16.vlgmr.msra.gmra.mxu2 %v272_v29  ;;  %396 = vmatmul.bf16.vlgmr.msra.gmra.mxu3 %v272_v29 }
 0x1cd   :  { %v269_v30 = vpop.f32.mrf.mxu1 }
 0x24f   :  { %v384_v34 = vpop.f32.mrf.mxu2  ;;  %v397_v35 = vpop.f32.mrf.mxu3 }
 0x250   :  { %v385_v36 = vadd.f32 %v384_v34, %v291_v32  ;;  %v398_v37 = vadd.f32 %v397_v35, %v292_v33 }
 0x252   :  { %585 = vtanh.f32 %v385_v36  ;;  %v407_v38 = vmax.f32 %v398_v37, -10.0 }
 0x254   :  { %v409_v39 = vmin.f32 %v407_v38, 2.0 }
 0x256   :  { %v412_v40 = vmul.f32 1.442695, %v409_v39 }
 0x257   :  { %v386_v41 = vpop.f32.mrf.mxu2  ;;  %v399_v42 = vpop.f32.mrf.mxu3 }
 0x258   :  { %v586_v43 = vpop.eup %585  ;;  %587 = vpow2.f32 %v412_v40 }
 0x259   :  { %418 = vst [vmem:[#allocation13] sm:$0xff] %v586_v43 }
 0x25e   :  { %v588_v44 = vpop.eup %587 }
 0x25f   :  { %419 = vst [vmem:[#allocation13 + $0x8] sm:$0xff] %v588_v44 }
 0x260   :  { %430 = dma.vmem_to_hbm [thread:$0]  %s426_s21, 256, %s428_s8, [#allocation4]  }
 0x261   :  { %765 = dma.done.wait [#allocation4], 256  }
 0x262   :  { %766 = vsyncadd [#allocation4], 4294967040 }
 0x263   :  { %435 = vsyncpa [#allocation3], 1 }
 0x264   :  { %436 = vsyncpa [#allocation6], 1 }
 0x265   :  { %437 = vsyncpa [#allocation9], 1 }
 0x266   :  { %438 = vsyncpa [#allocation12], 1 }
 0x267   :  { %439 = vsyncpa [#allocation4], 1 }

// kernel: tpu_custom_call.1
= control target key start
LH: loop header
LB: loop body
LE: loop exit
PB: predicated region body
PF: predicated region fallthrough
CT: control target
= control target key end

     0   :  { %14 = vsyncpa [#allocation3], 0  ;;  %s875_s0 = inlined_call_operand.hbm [shape: bf16[8,12], index: 0, kind: input, shape index: {}]   ;;  %s876_s1 = inlined_call_operand.hbm [shape: bf16[12,128], index: 1, kind: input, shape index: {}]   ;;  %s877_s2 = inlined_call_operand.vmem [shape: f32[1,128], index: 2, kind: input, shape index: {}]   ;;  %s878_s3 = inlined_call_operand.hbm [shape: f32[1,128], index: 3, kind: input, shape index: {}]   ;;  %s879_s4 = inlined_call_operand.hbm [shape: f32[1,128], index: 4, kind: input, shape index: {}]   ;;  %s880_s5 = inlined_call_operand.hbm [shape: bf16[128,128], index: 5, kind: input, shape index: {}]   ;;  %s881_s6 = inlined_call_operand.vmem [shape: f32[1,128], index: 6, kind: input, shape index: {}]   ;;  %s882_s7 = inlined_call_operand.hbm [shape: bf16[128,256], index: 7, kind: input, shape index: {}]   ;;  %s883_s8 = inlined_call_operand.vmem [shape: f32[1,256], index: 8, kind: input, shape index: {}]   ;;  %s884_s9 = inlined_call_operand.hbm [shape: f32[8,256], index: 9, kind: output, shape index: {}]  }
   0x1   :  { %15 = vsyncpa [#allocation6], 0 }
   0x2   :  { %16 = vsyncpa [#allocation9], 0 }
   0x3   :  { %17 = vsyncpa [#allocation12], 0  ;;  %s34_s11 = sshll.u32 %s876_s1, 4  ;;  %s35_s11 = int_to_ptr.hbm [resolvable:$true] %s34_s11 }
   0x4   :  { %18 = vsyncpa [#allocation4], 0  ;;  %s767_s12 = smov [#allocation5]   ;;  %s61_s16 = sshll.u32 %s879_s4, 4  ;;  %s62_s16 = int_to_ptr.hbm [resolvable:$true] %s61_s16 }
   0x5   :  { %s36_s13 = sshll.u32 %s767_s12, 4  ;;  %s768_s17 = smov 64   ;;  %s37_s13 = int_to_ptr.vmem [resolvable:$true] %s36_s13 }
   0x6   :  { %s769_s18 = smov 4   ;;  %s770_s19 = smov [#allocation8]  }
   0x7   :  { %42 = dma.hbm_to_vmem [thread:$0]  %s35_s11, 128, %s37_s13, [#allocation6], %s768_s17, %s768_s17, %s769_s18  }
   0x8   :  { %s63_s20 = sshll.u32 %s770_s19, 4  ;;  %s24_s22 = sshll.u32 %s875_s0, 4  ;;  %s64_s20 = int_to_ptr.vmem [resolvable:$true] %s63_s20  ;;  %s25_s22 = int_to_ptr.hbm [resolvable:$true] %s24_s22 }
   0x9   :  { %66 = dma.hbm_to_vmem [thread:$0]  %s62_s16, 16, %s64_s20, [#allocation9]  }
   0xa   :  { %s50_s4 = sshll.u32 %s878_s3, 4  ;;  %s771_s25 = smov [#allocation2]   ;;  %s51_s4 = int_to_ptr.hbm [resolvable:$true] %s50_s4 }
   0xb   :  { %s26_s26 = sshll.u32 %s771_s25, 4  ;;  %s772_s27 = smov [#allocation7]   ;;  %s27_s26 = int_to_ptr.vmem [resolvable:$true] %s26_s26 }
   0xc   :  { %29 = dma.hbm_to_vmem [thread:$0]  %s25_s22, 64, %s27_s26, [#allocation3]  }
   0xd   :  { %s52_s28 = sshll.u32 %s772_s27, 4  ;;  %s71_s10 = sshll.u32 %s880_s5, 4  ;;  %s53_s28 = int_to_ptr.vmem [resolvable:$true] %s52_s28  ;;  %s72_s10 = int_to_ptr.hbm [resolvable:$true] %s71_s10 }
   0xe   :  { %55 = dma.hbm_to_vmem [thread:$0]  %s51_s4, 16, %s53_s28, [#allocation6]  }
   0xf   :  { %s86_s12 = sshll.u32 %s882_s7, 4  ;;  %s773_s13 = smov [#allocation10]   ;;  %s87_s12 = int_to_ptr.hbm [resolvable:$true] %s86_s12 }
  0x10   :  { %s73_s3 = sshll.u32 %s773_s13, 4  ;;  %s774_s14 = smov [#allocation11]   ;;  %s74_s3 = int_to_ptr.vmem [resolvable:$true] %s73_s3 }
  0x11   :  { %79 = dma.hbm_to_vmem [thread:$0]  %s72_s10, 1024, %s74_s3, [#allocation9], %s768_s17, %s768_s17, %s769_s18  }
  0x12   :  { %s88_s15 = sshll.u32 %s774_s14, 4  ;;  %s775_s16 = smov 128   ;;  %s89_s15 = int_to_ptr.vmem [resolvable:$true] %s88_s15 }
  0x13   :  { %s776_s5 = smov 8  }
  0x14   :  { %94 = dma.hbm_to_vmem [thread:$0]  %s87_s12, 2048, %s89_s15, [#allocation12], %s775_s16, %s775_s16, %s776_s5  }
  0x15   :  { %757 = dma.done.wait [#allocation3], 64  }
  0x16   :  { %758 = vsyncadd [#allocation3], 4294967232 }
  0x17   :  { %759 = dma.done.wait [#allocation6], 144  }
  0x18   :  { %760 = vsyncadd [#allocation6], 4294967152 }
  0x19   :  { %761 = dma.done.wait [#allocation9], 1040  }
  0x1a   :  { %762 = vsyncadd [#allocation9], 4294966256 }
  0x1b   :  { %763 = dma.done.wait [#allocation12], 2048  }
  0x1c   :  { %764 = vsyncadd [#allocation12], 4294965248  ;;  %v442_v0 = vld [vmem:[#allocation5] sm:$0xf]  ;;  %v541_v1 = vld [vmem:[#allocation5] sm:$0x30] }
  0x1d   :  { %vm138_vm0 = vcmask 1045504   ;;  %v443_v2 = vor.u32 %v541_v1, %v442_v0  ;;  %v122_v4 = vld [vmem:[#allocation2] sm:$0xf]  ;;  %vm134_vm1 = vcmask 97280   ;;  %v549_v10 = vld [vmem:[#allocation10 + $0x38] sm:$0xff]  ;;  %v547_v12 = vld [vmem:[#allocation10 + $0x28] sm:$0xff] }
  0x1e   :  { %v577_v5 = vld [vmem:[%s877_s2] ss:$0 sm:$0xff]  ;;  %258 = vmatpush.bf16.msra.mxu1 %v549_v10  ;;  %v546_v13 = vld [vmem:[#allocation10 + $0x20] sm:$0xff]  ;;  %v545_v15 = vld [vmem:[#allocation10 + $0x18] sm:$0xff] }
  0x1f   :  { %v140_v3 = vsel %vm138_vm0, %v443_v2, 0  ;;  %v548_v11 = vld [vmem:[#allocation10 + $0x30] sm:$0xff]  ;;  %v543_v18 = vld [vmem:[#allocation10 + $0x8] sm:$0xff]  ;;  %v542_v23 = vld [vmem:[#allocation10] sm:$0xff] }
  0x20   :  { %149 = vmatpush.bf16.msra.mxu0 %v140_v3  ;;  %v544_v16 = vld [vmem:[#allocation10 + $0x10] sm:$0xff]  ;;  %v565_v27 = vld [vmem:[#allocation11 + $0x74] sm:$0xf0]  ;;  %v537_v30 = vld [vmem:[#allocation11 + $0x78] sm:$0xf0] }
  0x21   :  { %v535_v26 = vld [vmem:[#allocation11 + $0x70] sm:$0xf]  ;;  %v564_v28 = vld [vmem:[#allocation11 + $0x74] sm:$0xf]  ;;  %v527_v31 = vld [vmem:[#allocation11 + $0x60] sm:$0xf] }
  0x22   :  { %259 = vmatpush.bf16.msra.mxu1 %v548_v11  ;;  %v536_v29 = vor.u32 %v565_v27, %v535_v26  ;;  %v563_v32 = vld [vmem:[#allocation11 + $0x64] sm:$0xf0]  ;;  %v540_v33 = vor.u32 %v564_v28, %v537_v30  ;;  %v562_v34 = vld [vmem:[#allocation11 + $0x64] sm:$0xf]  ;;  %v529_v35 = vld [vmem:[#allocation11 + $0x68] sm:$0xf0] }
  0x23   :  { %444 = vmatmul.msk.bf16.vlgmr.msra.gmra.mxu0 %vm134_vm1, %v122_v4  ;;  %v528_v36 = vor.u32 %v563_v32, %v527_v31  ;;  %v532_v37 = vor.u32 %v562_v34, %v529_v35  ;;  %v519_v38 = vld [vmem:[#allocation11 + $0x50] sm:$0xf]  ;;  %v561_v39 = vld [vmem:[#allocation11 + $0x54] sm:$0xf0]  ;;  %v560_v41 = vld [vmem:[#allocation11 + $0x54] sm:$0xf] }
  0x24   :  { %375 = vmatpush.bf16.msra.mxu2 %v536_v29  ;;  %388 = vmatpush.bf16.msra.mxu3 %v540_v33  ;;  %v521_v42 = vld [vmem:[#allocation11 + $0x58] sm:$0xf0]  ;;  %v520_v44 = vor.u32 %v561_v39, %v519_v38  ;;  %v511_v47 = vld [vmem:[#allocation11 + $0x40] sm:$0xf]  ;;  %v559_v48 = vld [vmem:[#allocation11 + $0x44] sm:$0xf0] }
  0x25   :  { %v524_v46 = vor.u32 %v560_v41, %v521_v42  ;;  %v558_v49 = vld [vmem:[#allocation11 + $0x44] sm:$0xf]  ;;  %v513_v50 = vld [vmem:[#allocation11 + $0x48] sm:$0xf0]  ;;  %v512_v52 = vor.u32 %v559_v48, %v511_v47  ;;  %v503_v55 = vld [vmem:[#allocation11 + $0x30] sm:$0xf] }
  0x26   :  { %260 = vmatpush.bf16.msra.mxu1 %v547_v12  ;;  %v516_v54 = vor.u32 %v558_v49, %v513_v50  ;;  %v557_v56 = vld [vmem:[#allocation11 + $0x34] sm:$0xf0]  ;;  %v556_v57 = vld [vmem:[#allocation11 + $0x34] sm:$0xf]  ;;  %v505_v58 = vld [vmem:[#allocation11 + $0x38] sm:$0xf0] }
  0x27   :  { %v578_v61 = vld [vmem:[#allocation7] ss:$0 sm:$0xff]  ;;  %v504_v62 = vor.u32 %v557_v56, %v503_v55  ;;  %v508_v0 = vor.u32 %v556_v57, %v505_v58  ;;  %v495_v1 = vld [vmem:[#allocation11 + $0x20] sm:$0xf]  ;;  %v555_v2 = vld [vmem:[#allocation11 + $0x24] sm:$0xf0] }
  0x28   :  { %376 = vmatpush.bf16.msra.mxu2 %v528_v36  ;;  %389 = vmatpush.bf16.msra.mxu3 %v532_v37  ;;  %v579_v4 = vld [vmem:[#allocation8] ss:$0 sm:$0xff]  ;;  %v289_v31 = vld [vmem:[%s883_s8] sm:$0x3]  ;;  %s427_s8 = sshll.u32 %s884_s9, 4  ;;  %s428_s8 = int_to_ptr.hbm [resolvable:$true] %s427_s8 }
  0x29   :  { %v291_v32 = vperm.slane %v289_v31, 0  ;;  %v292_v33 = vperm.slane %v289_v31, 1 }
  0x2a   :  { %261 = vmatpush.bf16.msra.mxu1 %v546_v13  ;;  %v487_v13 = vld [vmem:[#allocation11 + $0x10] sm:$0xf] }
  0x2c   :  { %377 = vmatpush.bf16.msra.mxu2 %v520_v44  ;;  %390 = vmatpush.bf16.msra.mxu3 %v524_v46 }
  0x2e   :  { %262 = vmatpush.bf16.msra.mxu1 %v545_v15  ;;  %v552_v15 = vld [vmem:[#allocation11 + $0x14] sm:$0xf] }
  0x30   :  { %378 = vmatpush.bf16.msra.mxu2 %v512_v52  ;;  %391 = vmatpush.bf16.msra.mxu3 %v516_v54 }
  0x32   :  { %263 = vmatpush.bf16.msra.mxu1 %v544_v16 }
  0x34   :  { %379 = vmatpush.bf16.msra.mxu2 %v504_v62  ;;  %392 = vmatpush.bf16.msra.mxu3 %v508_v0 }
  0x36   :  { %264 = vmatpush.bf16.msra.mxu1 %v543_v18 }
  0x3a   :  { %265 = vmatpush.bf16.msra.mxu1 %v542_v23  ;;  %v481_v23 = vld [vmem:[#allocation11 + $0x8] sm:$0xf0] }
  0xa0   :  { %v151_v6 = vpop.f32.mrf.mxu0 }
  0xa1   :  { %v855_v7 = vadd.f32 %v577_v5, %v151_v6  ;;  %v554_v5 = vld [vmem:[#allocation11 + $0x24] sm:$0xf]  ;;  %v497_v6 = vld [vmem:[#allocation11 + $0x28] sm:$0xf0] }
  0xa2   :  { %v500_v10 = vor.u32 %v554_v5, %v497_v6 }
  0xa3   :  { %155 = vadd.xlane.f32.xlu0 %v855_v7  ;;  %v157_v9 = vmul.f32 %v855_v7, %v855_v7 }
  0xa4   :  { %393 = vmatpush.bf16.msra.mxu3 %v500_v10 }
  0xa8   :  { %v153_v8 = vpop.f32.mrf.mxu0 }
  0xab   :  { %158 = vadd.xlane.f32.xlu0 %v157_v9  ;;  %v496_v9 = vor.u32 %v555_v2, %v495_v1 }
  0xad   :  { %380 = vmatpush.bf16.msra.mxu2 %v496_v9 }
 0x116   :  { %v156_v14 = vpop.xlane.xlu0 %155 }
 0x117   :  { %v860_v17 = vmul.f32 0.03125, %v156_v14  ;;  %v553_v14 = vld [vmem:[#allocation11 + $0x14] sm:$0xf0] }
 0x118   :  { %v488_v16 = vor.u32 %v553_v14, %v487_v13 }
 0x119   :  { %v162_v20 = vmul.f32 %v860_v17, %v860_v17  ;;  %v165_v60 = vsub.f32 %v855_v7, %v860_v17  ;;  %v489_v17 = vld [vmem:[#allocation11 + $0x18] sm:$0xf0] }
 0x11a   :  { %v492_v18 = vor.u32 %v552_v15, %v489_v17  ;;  %381 = vmatpush.bf16.msra.mxu2 %v488_v16 }
 0x11c   :  { %394 = vmatpush.bf16.msra.mxu3 %v492_v18 }
 0x11e   :  { %v159_v19 = vpop.xlane.xlu0 %158 }
 0x11f   :  { %v161_v21 = vmul.f32 0.03125, %v159_v19  ;;  %v479_v19 = vld [vmem:[#allocation11] sm:$0xf] }
 0x121   :  { %v163_v22 = vsub.f32 %v161_v21, %v162_v20  ;;  %v551_v20 = vld [vmem:[#allocation11 + $0x4] sm:$0xf0]  ;;  %v550_v21 = vld [vmem:[#allocation11 + $0x4] sm:$0xf] }
 0x123   :  { %v164_v24 = vmax.f32 %v163_v22, 0.0  ;;  %v480_v22 = vor.u32 %v551_v20, %v479_v19 }
 0x125   :  { %v166_v25 = vadd.f32 1e-05, %v164_v24  ;;  %v484_v24 = vor.u32 %v550_v21, %v481_v23  ;;  %382 = vmatpush.bf16.msra.mxu2 %v480_v22 }
 0x127   :  { %581 = vrsqrt.f32 %v166_v25  ;;  %vm173_vm3 = vweird.f32 %v166_v25  ;;  %395 = vmatpush.bf16.msra.mxu3 %v484_v24 }
 0x12d   :  { %v582_v40 = vpop.eup %581 }
 0x12e   :  { %v168_v43 = vmul.f32 %v582_v40, %v166_v25  ;;  %vm174_vm2 = vweird.f32 %v582_v40  ;;  %v580_v25 = vld [vmem:[%s881_s6] ss:$0 sm:$0xff]  ;;  %s777_s6 = smov [#allocation13]  }
 0x12f   :  { %vm175_vm4 = vmor %vm173_vm3, %vm174_vm2  ;;  %s425_s21 = sshll.u32 %s777_s6, 4  ;;  %s426_s21 = int_to_ptr.vmem [resolvable:$true] %s425_s21 }
 0x130   :  { %v169_v45 = vmul.f32 %v582_v40, %v168_v43 }
 0x132   :  { %v170_v51 = vmul.f32 0.5, %v169_v45 }
 0x134   :  { %v171_v53 = vsub.f32 1.5, %v170_v51 }
 0x136   :  { %v172_v59 = vmul.f32 %v582_v40, %v171_v53 }
 0x138   :  { %v176_v63 = vsel %vm175_vm4, %v582_v40, %v172_v59 }
 0x139   :  { %v177_v3 = vmul.f32 %v176_v63, %v165_v60 }
 0x13b   :  { %v182_v8 = vmul.f32 %v578_v61, %v177_v3 }
 0x13d   :  { %v187_v11 = vadd.f32 %v579_v4, %v182_v8 }
 0x13f   :  { %583 = vtanh.f32 %v187_v11 }
 0x145   :  { %v584_v7 = vpop.eup %583 }
 0x146   :  { %v189_v12 = vpack.c.bf16 %v584_v7, %v584_v7 }
 0x148   :  { %266 = vmatmul.bf16.vlgmr.msra.gmra.mxu1 %v189_v12 }
 0x1c5   :  { %v267_v26 = vpop.f32.mrf.mxu1 }
 0x1c6   :  { %v268_v27 = vadd.f32 %v580_v25, %v267_v26 }
 0x1c8   :  { %v271_v28 = vmax.f32 %v268_v27, 0.0 }
 0x1ca   :  { %v272_v29 = vpack.c.bf16 %v271_v28, %v271_v28 }
 0x1cc   :  { %383 = vmatmul.bf16.vlgmr.msra.gmra.mxu2 %v272_v29  ;;  %396 = vmatmul.bf16.vlgmr.msra.gmra.mxu3 %v272_v29 }
 0x1cd   :  { %v269_v30 = vpop.f32.mrf.mxu1 }
 0x24f   :  { %v384_v34 = vpop.f32.mrf.mxu2  ;;  %v397_v35 = vpop.f32.mrf.mxu3 }
 0x250   :  { %v385_v36 = vadd.f32 %v384_v34, %v291_v32  ;;  %v398_v37 = vadd.f32 %v397_v35, %v292_v33 }
 0x252   :  { %585 = vtanh.f32 %v385_v36  ;;  %v407_v38 = vmax.f32 %v398_v37, -10.0 }
 0x254   :  { %v409_v39 = vmin.f32 %v407_v38, 2.0 }
 0x256   :  { %v412_v40 = vmul.f32 1.442695, %v409_v39 }
 0x257   :  { %v386_v41 = vpop.f32.mrf.mxu2  ;;  %v399_v42 = vpop.f32.mrf.mxu3 }
 0x258   :  { %v586_v43 = vpop.eup %585  ;;  %587 = vpow2.f32 %v412_v40 }
 0x259   :  { %418 = vst [vmem:[#allocation13] sm:$0xff] %v586_v43 }
 0x25e   :  { %v588_v44 = vpop.eup %587 }
 0x25f   :  { %419 = vst [vmem:[#allocation13 + $0x8] sm:$0xff] %v588_v44 }
 0x260   :  { %430 = dma.vmem_to_hbm [thread:$0]  %s426_s21, 256, %s428_s8, [#allocation4]  }
 0x261   :  { %765 = dma.done.wait [#allocation4], 256  }
 0x262   :  { %766 = vsyncadd [#allocation4], 4294967040 }
 0x263   :  { %435 = vsyncpa [#allocation3], 1 }
 0x264   :  { %436 = vsyncpa [#allocation6], 1 }
 0x265   :  { %437 = vsyncpa [#allocation9], 1 }
 0x266   :  { %438 = vsyncpa [#allocation12], 1 }
 0x267   :  { %439 = vsyncpa [#allocation4], 1 }

</bundles_post_ra>
